<compile_context>
chip_gen: v7x
topology: tpu7x:2x2x1
jax: 0.10.0
libtpu: 0.0.40
codegen_flags: <defaults>
</compile_context>

<pallas_src>
import functools

import jax
import jax.numpy as jnp
from jax.experimental import pallas as pl
from jax.experimental.pallas import tpu as pltpu


_LANES = 512          # lane-dense slab width (multiple of 128 lanes)
_MAX_TILE_ROWS = 512  # (512, 512) f32 tile = 1 MiB per input stream


def _loss_masked_kernel(o_ref, t_ref, m_ref, out_ref, *, loss_type):
    k = pl.program_id(1)  # reduction ("arbitrary") axis

    @pl.when(k == 0)
    def _():
        out_ref[...] = jnp.zeros_like(out_ref)

    d = o_ref[...].astype(jnp.float32) - t_ref[...].astype(jnp.float32)
    d = d * m_ref[...].astype(jnp.float32)   # mask cast in-kernel (int8/uint8 ok)
    v = d * d if loss_type == "l2" else jnp.abs(d)
    # per-lane partial sums; the cross-lane reduce happens once in the wrapper
    out_ref[...] += jnp.sum(v, axis=0, keepdims=True)


def _loss_kernel(o_ref, t_ref, out_ref, *, loss_type):
    k = pl.program_id(1)

    @pl.when(k == 0)
    def _():
        out_ref[...] = jnp.zeros_like(out_ref)

    d = o_ref[...].astype(jnp.float32) - t_ref[...].astype(jnp.float32)
    v = d * d if loss_type == "l2" else jnp.abs(d)
    out_ref[...] += jnp.sum(v, axis=0, keepdims=True)


def _plan_layout(total):
    """Lane-dense (rows, _LANES) slab + row tiling for the reduction grid."""
    rows_raw = -(-total // _LANES)                 # ceil-div
    if rows_raw <= _MAX_TILE_ROWS:
        tile_rows = rows_raw                       # single full-extent block
        rows = rows_raw
    else:
        tile_rows = None
        for t in (512, 256, 128, 64):              # prefer a divisor: no pad copy
            if rows_raw % t == 0:
                tile_rows = t
                break
        if tile_rows is None:
            tile_rows = _MAX_TILE_ROWS             # pad the last tile instead
        rows = -(-rows_raw // tile_rows) * tile_rows
    return rows, tile_rows


def _to_slab(x, rows):
    flat = x.reshape(-1)
    pad = rows * _LANES - flat.shape[0]
    if pad:
        # zero padding is loss-neutral: diff == 0 contributes nothing to the sum
        flat = jnp.pad(flat, (0, pad))
    return flat.reshape(rows, _LANES)


class DenoiserHead:
    def __init__(self, loss_type, loss_weight):
        if loss_type not in ("l2", "l1"):
            raise TypeError
        self.loss_type = loss_type
        self.loss_weight = loss_weight

    def forward(self, base_output):
        # forward is the identity; returning the input avoids a pointless
        # full-array HBM read+write (identity-copy kernel removed on purpose).
        return base_output

    def loss(self, base_output, target=None, mask=None):
        output = self.forward(base_output)          # identity, no kernel launch
        numel = output.size
        rows, tile_rows = _plan_layout(numel)
        steps = rows // tile_rows

        # Split the reduction into independent partial sums along a leading
        # "parallel" axis so v7x's two TensorCores can both stream HBM.
        num_parts = 2 if (steps % 2 == 0 and steps >= 2) else 1
        steps_per_part = steps // num_parts

        o2d = _to_slab(output, rows)
        t2d = _to_slab(target, rows)
        operands = [o2d, t2d]

        in_spec = pl.BlockSpec(
            (tile_rows, _LANES),
            lambda i, k, s=steps_per_part: (i * s + k, 0))
        in_specs = [in_spec, in_spec]

        if mask is None:
            # no synthesized all-ones mask: dedicated 2-stream kernel
            kern = functools.partial(_loss_kernel, loss_type=self.loss_type)
        else:
            operands.append(_to_slab(mask, rows))
            in_specs.append(in_spec)
            kern = functools.partial(_loss_masked_kernel,
                                     loss_type=self.loss_type)

        partial = pl.pallas_call(
            kern,
            out_shape=jax.ShapeDtypeStruct((1, num_parts * _LANES), jnp.float32),
            grid=(num_parts, steps_per_part),
            in_specs=in_specs,
            # disjoint lane-block per "parallel" part, resident across the
            # "arbitrary" reduction axis
            out_specs=pl.BlockSpec((1, _LANES), lambda i, k: (0, i)),
            compiler_params=pltpu.CompilerParams(
                dimension_semantics=("parallel", "arbitrary"),
                vmem_limit_bytes=32 * 1024 * 1024),
        )(*operands)

        # mean reduction (divide by original numel, padding contributed 0) + weight
        scale = float(self.loss_weight[self.loss_type]) / float(numel)
        loss_val = jnp.sum(partial) * jnp.float32(scale)

        loss = {self.loss_type: loss_val, "loss_total": loss_val}
        model_info = {}
        return loss, model_info


if __name__ == "__main__":
    key = jax.random.PRNGKey(0)
    k_x, k_t, k_m = jax.random.split(key, 3)

    # NCHW shapes consistent with a denoiser base-model output
    x = jax.random.normal(k_x, (2, 4, 16, 16), dtype=jnp.float32)
    target = jax.random.normal(k_t, (2, 4, 16, 16), dtype=jnp.float32)
    mask = (jax.random.uniform(k_m, (2, 4, 16, 16)) > 0.5).astype(jnp.float32)

    loss_weight = {"l2": 0.5, "l1": 1.0}

    head = DenoiserHead(loss_type="l2", loss_weight=loss_weight)

    # forward: identity passthrough
    out = jax.block_until_ready(head.forward(x))
    assert jnp.array_equal(out, x), "forward is not identity"

    # masked MSE * weight vs pure-JAX reference
    (loss, model_info) = head.loss(x, target=target, mask=mask)
    total = jax.block_until_ready(loss["loss_total"])
    ref = jnp.mean((x * mask - target * mask) ** 2) * loss_weight["l2"]
    assert jnp.allclose(total, ref, rtol=1e-5, atol=1e-6), (total, ref)

    # unmasked path (no mask stream at all)
    (loss_nm, _) = head.loss(x, target=target, mask=None)
    total_nm = jax.block_until_ready(loss_nm["loss_total"])
    ref_nm = jnp.mean((x - target) ** 2) * loss_weight["l2"]
    assert jnp.allclose(total_nm, ref_nm, rtol=1e-5, atol=1e-6), (total_nm, ref_nm)

    # L1 path with a narrow (int8) mask, cast inside the kernel
    head_l1 = DenoiserHead(loss_type="l1", loss_weight=loss_weight)
    mask_i8 = mask.astype(jnp.int8)
    (loss_l1, _) = head_l1.loss(x, target=target, mask=mask_i8)
    total_l1 = jax.block_until_ready(loss_l1["loss_total"])
    ref_l1 = jnp.mean(jnp.abs(x * mask - target * mask)) * loss_weight["l1"]
    assert jnp.allclose(total_l1, ref_l1, rtol=1e-5, atol=1e-6), (total_l1, ref_l1)

    print("KERNEL_OK")
</pallas_src>

<mosaic_0001>
module attributes {stable_mosaic.version = 11 : i64} {
  func.func @_loss_masked_kernel(%arg0: i32, %arg1: i32, %arg2: memref<4x512xf32, #tpu.memory_space<vmem>>, %arg3: memref<4x512xf32, #tpu.memory_space<vmem>>, %arg4: memref<4x512xf32, #tpu.memory_space<vmem>>, %arg5: memref<1x512xf32, #tpu.memory_space<vmem>>) attributes {dimension_semantics = [#tpu.dimension_semantics<parallel>, #tpu.dimension_semantics<arbitrary>], iteration_bounds = array<i64: 1, 1>, scalar_prefetch = 0 : i64, scratch_operands = 0 : i64, tpu.core_type = #tpu.core_type<tc>, window_params = [{transform_indices = @transform_0, window_bounds = array<i64: 4, 512>}, {transform_indices = @transform_1, window_bounds = array<i64: 4, 512>}, {transform_indices = @transform_2, window_bounds = array<i64: 4, 512>}, {transform_indices = @transform_3, window_bounds = array<i64: 1, 512>}]} {
    %c0_i32 = arith.constant 0 : i32
    %0 = arith.cmpi eq, %arg1, %c0_i32 : i32
    %1 = arith.extui %0 : i1 to i32
    %c0_i32_0 = arith.constant 0 : i32
    %2 = arith.cmpi ne, %1, %c0_i32_0 : i32
    scf.if %2 {
      %cst_10 = arith.constant 0.000000e+00 : f32
      %14 = vector.broadcast %cst_10 : f32 to vector<1x512xf32>
      %c0_11 = arith.constant 0 : index
      %c0_12 = arith.constant 0 : index
      %15 = vector.load %arg5[%c0_11, %c0_12] : memref<1x512xf32, #tpu.memory_space<vmem>>, vector<1x512xf32>
      tpu.vector_store %arg5[%c0_11, %c0_12], %14 {strides = array<i32>} : memref<1x512xf32, #tpu.memory_space<vmem>>, vector<1x512xf32>,
    } else {
    }
    %c0 = arith.constant 0 : index
    %c0_1 = arith.constant 0 : index
    %3 = vector.load %arg2[%c0, %c0_1] : memref<4x512xf32, #tpu.memory_space<vmem>>, vector<4x512xf32>
    %c0_2 = arith.constant 0 : index
    %c0_3 = arith.constant 0 : index
    %4 = vector.load %arg3[%c0_2, %c0_3] : memref<4x512xf32, #tpu.memory_space<vmem>>, vector<4x512xf32>
    %5 = arith.subf %3, %4 : vector<4x512xf32>
    %c0_4 = arith.constant 0 : index
    %c0_5 = arith.constant 0 : index
    %6 = vector.load %arg4[%c0_4, %c0_5] : memref<4x512xf32, #tpu.memory_space<vmem>>, vector<4x512xf32>
    %7 = arith.mulf %5, %6 : vector<4x512xf32>
    %8 = arith.mulf %7, %7 : vector<4x512xf32>
    %c0_6 = arith.constant 0 : index
    %c0_7 = arith.constant 0 : index
    %9 = vector.load %arg5[%c0_6, %c0_7] : memref<1x512xf32, #tpu.memory_space<vmem>>, vector<1x512xf32>
    %cst = arith.constant dense<0.000000e+00> : vector<512xf32>
    %10 = vector.multi_reduction <add>, %8, %cst [0] : vector<4x512xf32> to vector<512xf32>
    %11 = vector.shape_cast %10 : vector<512xf32> to vector<1x512xf32>
    %12 = arith.addf %9, %11 : vector<1x512xf32>
    %c0_8 = arith.constant 0 : index
    %c0_9 = arith.constant 0 : index
    %13 = vector.load %arg5[%c0_8, %c0_9] : memref<1x512xf32, #tpu.memory_space<vmem>>, vector<1x512xf32>
    tpu.vector_store %arg5[%c0_8, %c0_9], %12 {strides = array<i32>} : memref<1x512xf32, #tpu.memory_space<vmem>>, vector<1x512xf32>,
    return
  }
  func.func @transform_0(%arg0: i32, %arg1: i32) -> (i32, i32) {
    %c1_i32 = arith.constant 1 : i32
    %0 = arith.muli %arg0, %c1_i32 : i32
    %1 = arith.addi %0, %arg1 : i32
    %c0_i32 = arith.constant 0 : i32
    %c0_i32_0 = arith.constant 0 : i32
    return %1, %c0_i32 : i32, i32
  }
  func.func @transform_1(%arg0: i32, %arg1: i32) -> (i32, i32) {
    %c1_i32 = arith.constant 1 : i32
    %0 = arith.muli %arg0, %c1_i32 : i32
    %1 = arith.addi %0, %arg1 : i32
    %c0_i32 = arith.constant 0 : i32
    %c0_i32_0 = arith.constant 0 : i32
    return %1, %c0_i32 : i32, i32
  }
  func.func @transform_2(%arg0: i32, %arg1: i32) -> (i32, i32) {
    %c1_i32 = arith.constant 1 : i32
    %0 = arith.muli %arg0, %c1_i32 : i32
    %1 = arith.addi %0, %arg1 : i32
    %c0_i32 = arith.constant 0 : i32
    %c0_i32_0 = arith.constant 0 : i32
    return %1, %c0_i32 : i32, i32
  }
  func.func @transform_3(%arg0: i32, %arg1: i32) -> (i32, i32) {
    %c0_i32 = arith.constant 0 : i32
    %c0_i32_0 = arith.constant 0 : i32
    return %c0_i32, %arg0 : i32, i32
  }
}

</mosaic_0001>

<bundles_post_ra>
// kernel: tpu_custom_call.1
= control target key start
LH: loop header
LB: loop body
LE: loop exit
PB: predicated region body
PF: predicated region fallthrough
CT: control target
= control target key end

     0   :  { %8 = vsyncpa [#allocation3], 0  ;;  %s355_s0 = inlined_call_operand.hbm [shape: f32[4,512], index: 0, kind: input, shape index: {}]   ;;  %s356_s1 = inlined_call_operand.hbm [shape: f32[4,512], index: 1, kind: input, shape index: {}]   ;;  %s357_s2 = inlined_call_operand.hbm [shape: f32[4,512], index: 2, kind: input, shape index: {}]   ;;  %s358_s3 = inlined_call_operand.hbm [shape: f32[1,512], index: 3, kind: output, shape index: {}]  }
   0x1   :  { %9 = vsyncpa [#allocation6], 0 }
   0x2   :  { %10 = vsyncpa [#allocation4], 0  ;;  %s273_s12 = smov [#allocation5]   ;;  %s274_s14 = smov [#allocation2]  }
   0x3   :  { %s35_s13 = sshll.u32 %s273_s12, 4  ;;  %s21_s15 = sshll.u32 %s274_s14, 4  ;;  %s36_s13 = int_to_ptr.vmem [resolvable:$true] %s35_s13  ;;  %s22_s15 = int_to_ptr.vmem [resolvable:$true] %s21_s15 }
   0x4   :  { %s179_s18 = scalar_lea.hbm %s356_s1, 256 }
   0x5   :  { %p180_p0 = scmp.ne.s32.totalorder %s356_s1, %s179_s18  ;;  %p183_p1 = scmp.lt.u32.totalorder %s179_s18, %s356_s1 }
   0x7   :  { %p185_p2 = pnand %p183_p1, %p180_p0 }
   0x9   :  { %188 = shalt.err (!%p185_p2)
}
   0xa   :  { %s189_s23 = scalar_lea.vmem %s36_s13, 256  ;;  %p194_p4 = scmp.lt.s32.totalorder %s36_s13, %s36_s13 }
   0xb   :  { %p190_p3 = scmp.ne.s32.totalorder %s36_s13, %s189_s23  ;;  %p195_p5 = scmp.lt.s32.totalorder %s189_s23, %s189_s23 }
   0xd   :  { %p196_p6 = por %p195_p5, %p194_p4 }
   0xf   :  { %p197_p7 = pnand %p196_p6, %p190_p3 }
  0x11   :  { %200 = shalt.err (!%p197_p7)
}
  0x12   :  { %38 = dma.hbm_to_vmem [thread:$0]  %s356_s1, 256, %s36_s13, [#allocation6]  }
  0x13   :  { %s201_s28 = scalar_lea.hbm %s355_s0, 256 }
  0x14   :  { %p202_p8 = scmp.ne.s32.totalorder %s355_s0, %s201_s28  ;;  %p205_p9 = scmp.lt.u32.totalorder %s201_s28, %s355_s0 }
  0x16   :  { %p207_p10 = pnand %p205_p9, %p202_p8 }
  0x18   :  { %210 = shalt.err (!%p207_p10)
}
  0x19   :  { %s211_s6 = scalar_lea.vmem %s22_s15, 256  ;;  %p216_p12 = scmp.lt.s32.totalorder %s22_s15, %s22_s15 }
  0x1a   :  { %p212_p11 = scmp.ne.s32.totalorder %s22_s15, %s211_s6  ;;  %p217_p13 = scmp.lt.s32.totalorder %s211_s6, %s211_s6 }
  0x1c   :  { %p218_p0 = por %p217_p13, %p216_p12 }
  0x1e   :  { %p219_p1 = pnand %p218_p0, %p212_p11 }
  0x20   :  { %222 = shalt.err (!%p219_p1)
}
  0x21   :  { %24 = dma.hbm_to_vmem [thread:$0]  %s355_s0, 256, %s22_s15, [#allocation3]  }
  0x22   :  { %s275_s8 = smov [#allocation7]   ;;  %s223_s12 = scalar_lea.hbm %s357_s2, 256 }
  0x23   :  { %s49_s9 = sshll.u32 %s275_s8, 4  ;;  %p224_p2 = scmp.ne.s32.totalorder %s357_s2, %s223_s12  ;;  %s50_s9 = int_to_ptr.vmem [resolvable:$true] %s49_s9 }
  0x24   :  { %p227_p3 = scmp.lt.u32.totalorder %s223_s12, %s357_s2 }
  0x26   :  { %p229_p4 = pnand %p227_p3, %p224_p2 }
  0x28   :  { %232 = shalt.err (!%p229_p4)
}
  0x29   :  { %s233_s18 = scalar_lea.vmem %s50_s9, 256  ;;  %p238_p6 = scmp.lt.s32.totalorder %s50_s9, %s50_s9 }
  0x2a   :  { %p234_p5 = scmp.ne.s32.totalorder %s50_s9, %s233_s18  ;;  %p239_p7 = scmp.lt.s32.totalorder %s233_s18, %s233_s18 }
  0x2c   :  { %p240_p8 = por %p239_p7, %p238_p6 }
  0x2e   :  { %p241_p9 = pnand %p240_p8, %p234_p5 }
  0x30   :  { %244 = shalt.err (!%p241_p9)
}
  0x31   :  { %52 = dma.hbm_to_vmem [thread:$0]  %s357_s2, 256, %s50_s9, [#allocation6]  }
  0x32   :  { %267 = dma.done.wait [#allocation3], 256  }
  0x33   :  { %268 = vsyncadd [#allocation3], 4294967040 }
  0x34   :  { %269 = dma.done.wait [#allocation6], 512  }
  0x35   :  { %270 = vsyncadd [#allocation6], 4294966784  ;;  %v69_v0 = vlaneseq  ;;  %v276_v2 = vmov 0.0   ;;  %v74_v3 = vld [vmem:[#allocation2] sm:$0xff]  ;;  %v75_v4 = vld [vmem:[#allocation2 + $0x8] sm:$0xff]  ;;  %vm93_vm1 = vcmask 1043456  }
  0x36   :  { %v76_v5 = vld [vmem:[#allocation5] sm:$0xff]  ;;  %v77_v6 = vld [vmem:[#allocation5 + $0x8] sm:$0xff]  ;;  %v80_v8 = vld [vmem:[#allocation7] sm:$0xff]  ;;  %v277_v29 = vmov 1966171168   ;;  %s278_s2 = smov [#allocation8]  }
  0x37   :  { %vm335_vm0 = vcmp.lt.s32.totalorder %v69_v0, 512  ;;  %v78_v7 = vsub.f32 %v74_v3, %v76_v5  ;;  %v81_v9 = vld [vmem:[#allocation7 + $0x8] sm:$0xff]  ;;  %v79_v10 = vsub.f32 %v75_v4, %v77_v6  ;;  %v129_v30 = vunpack.c.l.s4 %v277_v29  ;;  %s163_s19 = sshll.u32 %s278_s2, 4  ;;  %s164_s19 = int_to_ptr.vmem [resolvable:$true] %s163_s19 }
  0x38   :  { %73 = vst.msk [vmem:[#allocation8] sm:$0xf] %vm335_vm0, %v276_v2  ;;  %v132_v40 = vshrl.u32 %v69_v0, 7  ;;  %s245_s20 = scalar_lea.vmem %s164_s19, 64  ;;  %p250_p11 = scmp.lt.s32.totalorder %s164_s19, %s164_s19 }
  0x39   :  { %v82_v11 = vmul.f32 %v80_v8, %v78_v7  ;;  %v83_v12 = vmul.f32 %v81_v9, %v79_v10  ;;  %v130_v39 = vunpack.c.0.s8 %v129_v30  ;;  %p246_p10 = scmp.ne.s32.totalorder %s164_s19, %s245_s20  ;;  %p251_p12 = scmp.lt.s32.totalorder %s245_s20, %s245_s20 }
  0x3b   :  { %v84_v13 = vmul.f32 %v82_v11, %v82_v11  ;;  %v85_v14 = vmul.f32 %v83_v12, %v83_v12  ;;  %v133_v48 = vsub.s32 %v130_v39, %v132_v40  ;;  %p252_p13 = por %p251_p12, %p250_p11 }
  0x3d   :  { %v89_v15 = vcombine.high %v84_v13, %v84_v13  ;;  %v94_v16 = vsel %vm93_vm1, %v84_v13, 0.0  ;;  %v90_v17 = vcombine.high %v85_v14, %v85_v14  ;;  %v108_v19 = vsel %vm93_vm1, %v85_v14, 0.0  ;;  %p253_p0 = pnand %p252_p13, %p246_p10 }
  0x3e   :  { %v95_v18 = vrot.slane %v94_v16, 4  ;;  %v109_v21 = vrot.slane %v108_v19, 4 }
  0x3f   :  { %v101_v20 = vsel %vm93_vm1, %v89_v15, 0.0  ;;  %v115_v24 = vsel %vm93_vm1, %v90_v17, 0.0  ;;  %v86_v55 = vld [vmem:[#allocation8] sm:$0xf] }
  0x40   :  { %v96_v22 = vadd.f32 %v95_v18, %v94_v16  ;;  %v102_v23 = vrot.slane %v101_v20, 4  ;;  %v110_v25 = vadd.f32 %v109_v21, %v108_v19  ;;  %v116_v26 = vrot.slane %v115_v24, 4 }
  0x42   :  { %v97_v27 = vrot.slane %v96_v22, 2  ;;  %v103_v28 = vadd.f32 %v102_v23, %v101_v20  ;;  %v111_v31 = vrot.slane %v110_v25, 2  ;;  %v117_v32 = vadd.f32 %v116_v26, %v115_v24 }
  0x44   :  { %v98_v33 = vadd.f32 %v97_v27, %v96_v22  ;;  %v104_v34 = vrot.slane %v103_v28, 2  ;;  %v112_v35 = vadd.f32 %v111_v31, %v110_v25  ;;  %v118_v36 = vrot.slane %v117_v32, 2 }
  0x46   :  { %v99_v37 = vrot.slane %v98_v33, 1  ;;  %v105_v38 = vadd.f32 %v104_v34, %v103_v28  ;;  %v113_v41 = vrot.slane %v112_v35, 1  ;;  %v119_v42 = vadd.f32 %v118_v36, %v117_v32 }
  0x48   :  { %v100_v43 = vadd.f32 %v99_v37, %v98_v33  ;;  %v106_v44 = vrot.slane %v105_v38, 1  ;;  %v114_v45 = vadd.f32 %v113_v41, %v112_v35  ;;  %v120_v46 = vrot.slane %v119_v42, 1 }
  0x4a   :  { %v107_v47 = vadd.f32 %v106_v44, %v105_v38  ;;  %v121_v49 = vadd.f32 %v120_v46, %v119_v42 }
  0x4c   :  { %v126_v50 = vcombine.low %v100_v43, %v107_v47  ;;  %v127_v51 = vcombine.low %v114_v45, %v121_v49 }
  0x4e   :  { %v134_v52 = vrot.slane %v126_v50, %v133_v48  ;;  %v141_v53 = vrot.slane %v127_v51, %v133_v48 }
  0x50   :  { %v142_v54 = vcombine.low %v134_v52, %v141_v53 }
  0x52   :  { %v149_v56 = vrot.slane %v142_v54, %v133_v48 }
  0x54   :  { %v151_v57 = vadd.f32 %v149_v56, %v86_v55 }
  0x56   :  { %156 = vst.msk [vmem:[#allocation8] sm:$0xf] %vm335_vm0, %v151_v57 }
  0x57   :  { %256 = shalt.err (!%p253_p0)
}
  0x58   :  { %s257_s23 = scalar_lea.hbm %s358_s3, 64 }
  0x59   :  { %p258_p1 = scmp.ne.s32.totalorder %s358_s3, %s257_s23  ;;  %p261_p2 = scmp.lt.u32.totalorder %s257_s23, %s358_s3 }
  0x5b   :  { %p263_p3 = pnand %p261_p2, %p258_p1 }
  0x5d   :  { %266 = shalt.err (!%p263_p3)
}
  0x5e   :  { %166 = dma.vmem_to_hbm [thread:$0]  %s164_s19, 64, %s358_s3, [#allocation4]  }
  0x5f   :  { %271 = dma.done.wait [#allocation4], 64  }
  0x60   :  { %272 = vsyncadd [#allocation4], 4294967232 }
  0x61   :  { %170 = vsyncpa [#allocation3], 1 }
  0x62   :  { %171 = vsyncpa [#allocation6], 1 }
  0x63   :  { %172 = vsyncpa [#allocation4], 1 }

</bundles_post_ra>
